<compile_context>
chip_gen: v7x
topology: tpu7x:2x2x1
jax: 0.10.0
libtpu: 0.0.40
codegen_flags: <defaults>
</compile_context>

<pallas_src>
import jax
import jax.numpy as jnp
from jax.experimental import pallas as pl
from jax.experimental.pallas import tpu as pltpu


# ---- packed parameter slab layout (rows x 128 lanes, f32) -------------------
_W1_ROW = 0      # rows   0..12 : W1 [13, 64]  (rows 0..7 = s0 part, 8..12 = s1 part)
_W2_ROW = 128    # rows 128..191: W2 [64, 32]  (padded to a full 128x128 block)
_W3_ROW = 256    # rows 256..287: W3 [32, 20]  (padded to a full 128x128 block)
_B_ROW = 384     # row  384 = b1 (64), 385 = b2 (32), 386 = b3 (20)
_SLAB_ROWS = 392  # multiple of 8


def _net_kernel(s0_ref, s1_ref, w_ref, o_ref):
    s0 = s0_ref[...]                                   # [TB, 8]
    s1 = s1_ref[...]                                   # [TB, 5]

    # Single aligned load of the bias block, then cheap value slices.
    bias = w_ref[_B_ROW:_B_ROW + 8, :]                 # [8, 128]
    b1 = bias[0:1, :]                                  # [1, 128] (lanes >=64 are 0)
    b2 = bias[1:2, :]                                  # [1, 128] (lanes >=32 are 0)
    b3 = bias[2:3, :]                                  # [1, 128] (lanes >=20 are 0)

    # fc1: split matmul replaces torch.cat((s0, s1), 1) @ W1.T
    h1 = jnp.dot(s0, w_ref[_W1_ROW:_W1_ROW + 8, :],
                 preferred_element_type=jnp.float32)
    h1 = h1 + jnp.dot(s1, w_ref[_W1_ROW + 8:_W1_ROW + 13, :],
                      preferred_element_type=jnp.float32)
    h1 = jnp.maximum(h1 + b1, 0.0)                     # [TB, 128]; lanes >=64 stay 0

    # fc2: W2 block is zero-padded to [128, 128], so a full 128-lane
    # contraction is exact (padded lanes of h1 are zero as well).
    h2 = jnp.dot(h1, w_ref[_W2_ROW:_W2_ROW + 128, :],
                 preferred_element_type=jnp.float32)
    h2 = jnp.maximum(h2 + b2, 0.0)                     # [TB, 128]; lanes >=32 stay 0

    # fc3 (no activation)
    out = jnp.dot(h2, w_ref[_W3_ROW:_W3_ROW + 128, :],
                  preferred_element_type=jnp.float32) + b3   # [TB, 128]

    o_ref[...] = out[:, 0:20].astype(o_ref.dtype)      # final narrow store only


def net_forward(s0, s1, w_slab, *, max_batch_tile=512):
    """s0: [B, 8], s1: [B, 5] float32; w_slab from pack_params(). Returns [B, 20]."""
    B = s0.shape[0]
    TB = B if B <= max_batch_tile else max_batch_tile   # TB == B or a multiple of 8
    grid = (pl.cdiv(B, TB),)

    return pl.pallas_call(
        _net_kernel,
        out_shape=jax.ShapeDtypeStruct((B, 20), jnp.float32),
        grid_spec=pltpu.PrefetchScalarGridSpec(
            num_scalar_prefetch=0,
            grid=grid,
            in_specs=[
                pl.BlockSpec((TB, 8), lambda i: (i, 0)),           # s0 tile
                pl.BlockSpec((TB, 5), lambda i: (i, 0)),           # s1 tile
                pl.BlockSpec((_SLAB_ROWS, 128), lambda i: (0, 0)), # weights resident
            ],
            out_specs=pl.BlockSpec((TB, 20), lambda i: (i, 0)),
        ),
        compiler_params=pltpu.CompilerParams(
            dimension_semantics=("parallel",),
        ),
    )(s0, s1, w_slab)


def init_params(key):
    """Mimics Net.init(): weights = abs(0.01 * randn), biases = 0.01.

    Weights are returned transposed as [in, out] for direct x @ W in-kernel.
    """
    k1, k2, k3 = jax.random.split(key, 3)
    # PyTorch weight shapes: fc1 (64, 13), fc2 (32, 64), fc3 (20, 32).
    w1 = jnp.abs(0.01 * jax.random.normal(k1, (64, 13), jnp.float32)).T  # [13, 64]
    w2 = jnp.abs(0.01 * jax.random.normal(k2, (32, 64), jnp.float32)).T  # [64, 32]
    w3 = jnp.abs(0.01 * jax.random.normal(k3, (20, 32), jnp.float32)).T  # [32, 20]
    b1 = jnp.full((64,), 0.01, jnp.float32)
    b2 = jnp.full((32,), 0.01, jnp.float32)
    b3 = jnp.full((20,), 0.01, jnp.float32)
    return (w1, b1, w2, b2, w3, b3)


def pack_params(params):
    """Pack all weights/biases into one lane-dense, zero-padded [392,128] slab."""
    w1, b1, w2, b2, w3, b3 = params
    slab = jnp.zeros((_SLAB_ROWS, 128), jnp.float32)
    slab = slab.at[_W1_ROW:_W1_ROW + 13, 0:64].set(w1)
    slab = slab.at[_W2_ROW:_W2_ROW + 64, 0:32].set(w2)
    slab = slab.at[_W3_ROW:_W3_ROW + 32, 0:20].set(w3)
    slab = slab.at[_B_ROW + 0, 0:64].set(b1)
    slab = slab.at[_B_ROW + 1, 0:32].set(b2)
    slab = slab.at[_B_ROW + 2, 0:20].set(b3)
    return slab


def _reference(s0, s1, params):
    w1, b1, w2, b2, w3, b3 = params
    x = jnp.concatenate([s0, s1], axis=1)
    h = jnp.maximum(x @ w1 + b1[None, :], 0.0)
    h = jnp.maximum(h @ w2 + b2[None, :], 0.0)
    return h @ w3 + b3[None, :]


if __name__ == "__main__":
    key = jax.random.PRNGKey(0)
    kp, ks0, ks1 = jax.random.split(key, 3)

    params = init_params(kp)
    slab = pack_params(params)

    # Small case (B = 2): single block, single grid step.
    B = 2
    s0 = jax.random.normal(ks0, (B, 8), jnp.float32)
    s1 = jax.random.normal(ks1, (B, 5), jnp.float32)
    out = net_forward(s0, s1, slab)
    jax.block_until_ready(out)
    ref = _reference(s0, s1, params)
    assert out.shape == (B, 20)
    assert jnp.allclose(out, ref, atol=1e-5, rtol=1e-5)

    # Larger case (B = 1024): exercises the batch grid (2 steps of 512),
    # resident-weight BlockSpec and the pipelined path.
    B2 = 1024
    k0, k1 = jax.random.split(jax.random.PRNGKey(1))
    s0b = jax.random.normal(k0, (B2, 8), jnp.float32)
    s1b = jax.random.normal(k1, (B2, 5), jnp.float32)
    outb = net_forward(s0b, s1b, slab)
    jax.block_until_ready(outb)
    refb = _reference(s0b, s1b, params)
    assert outb.shape == (B2, 20)
    assert jnp.allclose(outb, refb, atol=1e-5, rtol=1e-5)

    print("KERNEL_OK")
</pallas_src>

<mosaic_0001>
module attributes {stable_mosaic.version = 11 : i64} {
  func.func @_net_kernel(%arg0: i32, %arg1: memref<2x8xf32, #tpu.memory_space<vmem>>, %arg2: memref<2x5xf32, #tpu.memory_space<vmem>>, %arg3: memref<392x128xf32, #tpu.memory_space<vmem>>, %arg4: memref<2x20xf32, #tpu.memory_space<vmem>>) attributes {dimension_semantics = [#tpu.dimension_semantics<parallel>], iteration_bounds = array<i64: 1>, scalar_prefetch = 0 : i64, scratch_operands = 0 : i64, tpu.core_type = #tpu.core_type<tc>, window_params = [{transform_indices = @transform_0, window_bounds = array<i64: 2, 8>}, {transform_indices = @transform_1, window_bounds = array<i64: 2, 5>}, {pipeline_mode = #tpu.pipeline_mode<synchronous>, transform_indices = @transform_2, window_bounds = array<i64: 392, 128>}, {transform_indices = @transform_3, window_bounds = array<i64: 2, 20>}]} {
    %c0 = arith.constant 0 : index
    %c0_0 = arith.constant 0 : index
    %0 = vector.load %arg1[%c0, %c0_0] : memref<2x8xf32, #tpu.memory_space<vmem>>, vector<2x8xf32>
    %c0_1 = arith.constant 0 : index
    %c0_2 = arith.constant 0 : index
    %1 = vector.load %arg2[%c0_1, %c0_2] : memref<2x5xf32, #tpu.memory_space<vmem>>, vector<2x5xf32>
    %c384 = arith.constant 384 : index
    %c0_3 = arith.constant 0 : index
    %2 = vector.load %arg3[%c384, %c0_3] : memref<392x128xf32, #tpu.memory_space<vmem>>, vector<8x128xf32>
    %3 = vector.extract_strided_slice %2 {offsets = [0, 0], sizes = [1, 128], strides = [1, 1]} : vector<8x128xf32> to vector<1x128xf32>
    %4 = vector.extract_strided_slice %2 {offsets = [1, 0], sizes = [1, 128], strides = [1, 1]} : vector<8x128xf32> to vector<1x128xf32>
    %5 = vector.extract_strided_slice %2 {offsets = [2, 0], sizes = [1, 128], strides = [1, 1]} : vector<8x128xf32> to vector<1x128xf32>
    %c0_4 = arith.constant 0 : index
    %c0_5 = arith.constant 0 : index
    %6 = vector.load %arg3[%c0_4, %c0_5] : memref<392x128xf32, #tpu.memory_space<vmem>>, vector<8x128xf32>
    %cst = arith.constant dense<0.000000e+00> : vector<2x128xf32>
    %7 = tpu.matmul %0, %6, %cst {dimension_numbers = #tpu.dot_dimension_numbers<[1], [0], [0], [1], [0, 0, 1, 1], [], []>} : vector<2x8xf32>, vector<8x128xf32>, vector<2x128xf32> -> vector<2x128xf32>
    %c8 = arith.constant 8 : index
    %c0_6 = arith.constant 0 : index
    %8 = vector.load %arg3[%c8, %c0_6] : memref<392x128xf32, #tpu.memory_space<vmem>>, vector<5x128xf32>
    %cst_7 = arith.constant dense<0.000000e+00> : vector<2x128xf32>
    %9 = tpu.matmul %1, %8, %cst_7 {dimension_numbers = #tpu.dot_dimension_numbers<[1], [0], [0], [1], [0, 0, 1, 1], [], []>} : vector<2x5xf32>, vector<5x128xf32>, vector<2x128xf32> -> vector<2x128xf32>
    %10 = arith.addf %7, %9 : vector<2x128xf32>
    %11 = vector.broadcast %3 : vector<1x128xf32> to vector<2x128xf32>
    %12 = arith.addf %10, %11 : vector<2x128xf32>
    %cst_8 = arith.constant 0.000000e+00 : f32
    %13 = vector.broadcast %cst_8 : f32 to vector<2x128xf32>
    %14 = arith.maximumf %12, %13 : vector<2x128xf32>
    %c128 = arith.constant 128 : index
    %c0_9 = arith.constant 0 : index
    %15 = vector.load %arg3[%c128, %c0_9] : memref<392x128xf32, #tpu.memory_space<vmem>>, vector<128x128xf32>
    %cst_10 = arith.constant dense<0.000000e+00> : vector<2x128xf32>
    %16 = tpu.matmul %14, %15, %cst_10 {dimension_numbers = #tpu.dot_dimension_numbers<[1], [0], [0], [1], [0, 0, 1, 1], [], []>} : vector<2x128xf32>, vector<128x128xf32>, vector<2x128xf32> -> vector<2x128xf32>
    %17 = vector.broadcast %4 : vector<1x128xf32> to vector<2x128xf32>
    %18 = arith.addf %16, %17 : vector<2x128xf32>
    %cst_11 = arith.constant 0.000000e+00 : f32
    %19 = vector.broadcast %cst_11 : f32 to vector<2x128xf32>
    %20 = arith.maximumf %18, %19 : vector<2x128xf32>
    %c256 = arith.constant 256 : index
    %c0_12 = arith.constant 0 : index
    %21 = vector.load %arg3[%c256, %c0_12] : memref<392x128xf32, #tpu.memory_space<vmem>>, vector<128x128xf32>
    %cst_13 = arith.constant dense<0.000000e+00> : vector<2x128xf32>
    %22 = tpu.matmul %20, %21, %cst_13 {dimension_numbers = #tpu.dot_dimension_numbers<[1], [0], [0], [1], [0, 0, 1, 1], [], []>} : vector<2x128xf32>, vector<128x128xf32>, vector<2x128xf32> -> vector<2x128xf32>
    %23 = vector.broadcast %5 : vector<1x128xf32> to vector<2x128xf32>
    %24 = arith.addf %22, %23 : vector<2x128xf32>
    %25 = vector.extract_strided_slice %24 {offsets = [0, 0], sizes = [2, 20], strides = [1, 1]} : vector<2x128xf32> to vector<2x20xf32>
    %c0_14 = arith.constant 0 : index
    %c0_15 = arith.constant 0 : index
    %26 = vector.load %arg4[%c0_14, %c0_15] : memref<2x20xf32, #tpu.memory_space<vmem>>, vector<2x20xf32>
    tpu.vector_store %arg4[%c0_14, %c0_15], %25 {strides = array<i32>} : memref<2x20xf32, #tpu.memory_space<vmem>>, vector<2x20xf32>,
    return
  }
  func.func @transform_0(%arg0: i32) -> (i32, i32) {
    %c0_i32 = arith.constant 0 : i32
    %c0_i32_0 = arith.constant 0 : i32
    return %arg0, %c0_i32 : i32, i32
  }
  func.func @transform_1(%arg0: i32) -> (i32, i32) {
    %c0_i32 = arith.constant 0 : i32
    %c0_i32_0 = arith.constant 0 : i32
    return %arg0, %c0_i32 : i32, i32
  }
  func.func @transform_2(%arg0: i32) -> (i32, i32) {
    %c0_i32 = arith.constant 0 : i32
    %c0_i32_0 = arith.constant 0 : i32
    %c0_i32_1 = arith.constant 0 : i32
    return %c0_i32, %c0_i32_0 : i32, i32
  }
  func.func @transform_3(%arg0: i32) -> (i32, i32) {
    %c0_i32 = arith.constant 0 : i32
    %c0_i32_0 = arith.constant 0 : i32
    return %arg0, %c0_i32 : i32, i32
  }
}

</mosaic_0001>

<bundles_post_ra>
// kernel: tpu_custom_call.1
= control target key start
LH: loop header
LB: loop body
LE: loop exit
PB: predicated region body
PF: predicated region fallthrough
CT: control target
= control target key end

     0   :  { %8 = vsyncpa [#allocation3], 0  ;;  %s746_s0 = inlined_call_operand.hbm [shape: f32[2,8], index: 0, kind: input, shape index: {}]   ;;  %s747_s1 = inlined_call_operand.vmem [shape: f32[2,5], index: 1, kind: input, shape index: {}]   ;;  %s748_s2 = inlined_call_operand.hbm [shape: f32[392,128], index: 2, kind: input, shape index: {}]   ;;  %s749_s3 = inlined_call_operand.hbm [shape: f32[2,20], index: 3, kind: output, shape index: {}]  }
   0x1   :  { %9 = vsyncpa [#allocation6], 0 }
   0x2   :  { %10 = vsyncpa [#allocation4], 0  ;;  %s652_s12 = smov [#allocation2]   ;;  %s653_s14 = smov [#allocation5]  }
   0x3   :  { %s17_s13 = sshll.u32 %s652_s12, 4  ;;  %s28_s15 = sshll.u32 %s653_s14, 4  ;;  %s18_s13 = int_to_ptr.vmem [resolvable:$true] %s17_s13  ;;  %s680_s15 = int_to_ptr.vmem [resolvable:$true] %s28_s15 }
   0x4   :  { %s580_s18 = scalar_lea.hbm %s746_s0, 32 }
   0x5   :  { %p581_p0 = scmp.ne.s32.totalorder %s746_s0, %s580_s18  ;;  %p584_p1 = scmp.lt.u32.totalorder %s580_s18, %s746_s0 }
   0x7   :  { %p586_p2 = pnand %p584_p1, %p581_p0 }
   0x9   :  { %589 = shalt.err (!%p586_p2)
}
   0xa   :  { %s590_s23 = scalar_lea.vmem %s18_s13, 32  ;;  %p595_p4 = scmp.lt.s32.totalorder %s18_s13, %s18_s13 }
   0xb   :  { %p591_p3 = scmp.ne.s32.totalorder %s18_s13, %s590_s23  ;;  %p596_p5 = scmp.lt.s32.totalorder %s590_s23, %s590_s23 }
   0xd   :  { %p597_p6 = por %p596_p5, %p595_p4 }
   0xf   :  { %p598_p7 = pnand %p597_p6, %p591_p3 }
  0x11   :  { %601 = shalt.err (!%p598_p7)
}
  0x12   :  { %20 = dma.hbm_to_vmem [thread:$0]  %s746_s0, 32, %s18_s13, [#allocation3]  }
  0x13   :  { %s602_s28 = scalar_lea.hbm %s748_s2, 6272 }
  0x14   :  { %p603_p8 = scmp.ne.s32.totalorder %s748_s2, %s602_s28  ;;  %p606_p9 = scmp.lt.u32.totalorder %s602_s28, %s748_s2 }
  0x16   :  { %p608_p10 = pnand %p606_p9, %p603_p8 }
  0x18   :  { %611 = shalt.err (!%p608_p10)
}
  0x19   :  { %s612_s6 = scalar_lea.vmem %s680_s15, 6272  ;;  %p617_p12 = scmp.lt.s32.totalorder %s680_s15, %s680_s15 }
  0x1a   :  { %p613_p11 = scmp.ne.s32.totalorder %s680_s15, %s612_s6  ;;  %p618_p13 = scmp.lt.s32.totalorder %s612_s6, %s612_s6 }
  0x1c   :  { %p619_p0 = por %p618_p13, %p617_p12 }
  0x1e   :  { %p620_p1 = pnand %p619_p0, %p613_p11 }
  0x20   :  { %623 = shalt.err (!%p620_p1)
}
  0x21   :  { %s654_s0 = smov 128   ;;  %s655_s7 = smov 8  }
  0x22   :  { %34 = dma.hbm_to_vmem [thread:$0]  %s748_s2, 6272, %s680_s15, [#allocation6], %s654_s0, %s654_s0, %s655_s7  }
  0x23   :  { %646 = dma.done.wait [#allocation3], 32  }
  0x24   :  { %647 = vsyncadd [#allocation3], 4294967264 }
  0x25   :  { %648 = dma.done.wait [#allocation6], 6272  }
  0x26   :  { %649 = vsyncadd [#allocation6], 4294961024  ;;  %v656_v0 = vmov 0.0   ;;  %vm657_vm0 = vmmov 0   ;;  %vm50_vm1 = vcmask 1044480   ;;  %vm46_vm2 = vcmask 39936  }
  0x27   :  { %444 = vmatprep.subr.mxu0 %v656_v0  ;;  %449 = vmatprep.subr.mxu1 %v656_v0  ;;  %vm124_vm3 = vcmask 64512   ;;  %v45_v1 = vld [vmem:[#allocation5 + $0x8] sm:$0x1f]  ;;  %v44_v2 = vld [vmem:[#allocation5] sm:$0xff]  ;;  %v42_v3 = vld [vmem:[%s747_s1] sm:$0x3]  ;;  %v198_v51 = vlaneseq }
  0x28   :  { %446 = vmatprep.mubr.msk.f32.mxu0 %vm657_vm0, %v656_v0  ;;  %451 = vmatprep.mubr.msk.f32.mxu1 %vm657_vm0, %v656_v0  ;;  %v41_v4 = vld [vmem:[#allocation2] sm:$0x3]  ;;  %v204_v5 = vld [vmem:[#allocation5 + $0x80] sm:$0xff]  ;;  %v205_v6 = vld [vmem:[#allocation5 + $0x88] sm:$0xff]  ;;  %v658_v10 = vmov 0.0|0.0   ;;  %s659_s1 = smov [#allocation7]  }
  0x29   :  { %445 = vmatpush3.msk.msra.mxu0 %vm50_vm1, %v45_v1  ;;  %450 = vmatpush3.msra.mxu1 %v44_v2  ;;  %v525_v7 = vpack.c.bf16 %v205_v6, %v204_v5  ;;  %v206_v8 = vld [vmem:[#allocation5 + $0x90] sm:$0xff]  ;;  %v207_v9 = vld [vmem:[#allocation5 + $0x98] sm:$0xff]  ;;  %v208_v12 = vld [vmem:[#allocation5 + $0xa0] sm:$0xff]  ;;  %v199_v52 = vshrl.u32 %v198_v51, 7  ;;  %s393_s2 = sshll.u32 %s659_s1, 4  ;;  %vm385_vm4 = vcmask 156672   ;;  %s394_s2 = int_to_ptr.vmem [resolvable:$true] %s393_s2 }
  0x2a   :  { %447 = vmatmul.mubr.msk.f32.vlgmr.msra.gmra.mrb[0].mxu0 %vm46_vm2, %v42_v3  ;;  %452 = vmatmul.mubr.msk.f32.vlgmr.msra.gmra.mrb[0].mxu1 %vm124_vm3, %v41_v4  ;;  %v528_v11 = vpack.c.bf16 %v207_v9, %v206_v8  ;;  %v209_v13 = vld [vmem:[#allocation5 + $0xa8] sm:$0xff]  ;;  %v210_v15 = vld [vmem:[#allocation5 + $0xb0] sm:$0xff]  ;;  %v211_v16 = vld [vmem:[#allocation5 + $0xb8] sm:$0xff]  ;;  %s624_s12 = scalar_lea.vmem %s394_s2, 32  ;;  %p629_p3 = scmp.lt.s32.totalorder %s394_s2, %s394_s2 }
  0x2b   :  { %524 = vmatprep.subr.bf16.mxu0 %v658_v10  ;;  %486 = vmatprep.mubr.msk.f32.mxu0 %vm657_vm0, %v656_v0  ;;  %v531_v14 = vpack.c.bf16 %v209_v13, %v208_v12  ;;  %v534_v17 = vpack.c.bf16 %v211_v16, %v210_v15  ;;  %v212_v18 = vld [vmem:[#allocation5 + $0xc0] sm:$0xff]  ;;  %v213_v19 = vld [vmem:[#allocation5 + $0xc8] sm:$0xff]  ;;  %v214_v21 = vld [vmem:[#allocation5 + $0xd0] sm:$0xff]  ;;  %v200_v53 = vsub.s32 0, %v199_v52  ;;  %v222_v2 = vsub.s32 1, %v199_v52  ;;  %p625_p2 = scmp.ne.s32.totalorder %s394_s2, %s624_s12  ;;  %p630_p4 = scmp.lt.s32.totalorder %s624_s12, %s624_s12 }
  0x2c   :  { %526 = vmatpush3.bf16.msra.mxu0 %v525_v7  ;;  %548 = vmatprep.subr.bf16.mxu1 %v658_v10  ;;  %v537_v20 = vpack.c.bf16 %v213_v19, %v212_v18  ;;  %v215_v22 = vld [vmem:[#allocation5 + $0xd8] sm:$0xff]  ;;  %v216_v24 = vld [vmem:[#allocation5 + $0xe0] sm:$0xff]  ;;  %v217_v25 = vld [vmem:[#allocation5 + $0xe8] sm:$0xff]  ;;  %v313_v8 = vsub.s32 2, %v199_v52 }
  0x2d   :  { %527 = vmatprep.subr.bf16.mxu0 %v658_v10  ;;  %521 = vmatprep.mubr.msk.f32.mxu1 %vm657_vm0, %v656_v0  ;;  %v540_v23 = vpack.c.bf16 %v215_v22, %v214_v21  ;;  %v543_v26 = vpack.c.bf16 %v217_v25, %v216_v24  ;;  %v218_v27 = vld [vmem:[#allocation5 + $0xf0] sm:$0xff]  ;;  %v219_v28 = vld [vmem:[#allocation5 + $0xf8] sm:$0xff]  ;;  %v295_v30 = vld [vmem:[#allocation5 + $0x100] sm:$0xff]  ;;  %p631_p5 = por %p630_p4, %p629_p3 }
  0x2e   :  { %v546_v29 = vpack.c.bf16 %v219_v28, %v218_v27  ;;  %v296_v31 = vld [vmem:[#allocation5 + $0x108] sm:$0xff]  ;;  %v297_v32 = vld [vmem:[#allocation5 + $0x110] sm:$0xff]  ;;  %v298_v34 = vld [vmem:[#allocation5 + $0x118] sm:$0xff] }
  0x2f   :  { %v549_v33 = vpack.c.bf16 %v296_v31, %v295_v30  ;;  %v552_v35 = vpack.c.bf16 %v298_v34, %v297_v32  ;;  %v299_v36 = vld [vmem:[#allocation5 + $0x120] sm:$0xff]  ;;  %v300_v37 = vld [vmem:[#allocation5 + $0x128] sm:$0xff]  ;;  %v301_v39 = vld [vmem:[#allocation5 + $0x130] sm:$0xff]  ;;  %p632_p6 = pnand %p631_p5, %p625_p2 }
  0x30   :  { %529 = vmatpush3.bf16.msra.mxu0 %v528_v11  ;;  %v555_v38 = vpack.c.bf16 %v300_v37, %v299_v36  ;;  %v302_v40 = vld [vmem:[#allocation5 + $0x138] sm:$0xff]  ;;  %v303_v42 = vld [vmem:[#allocation5 + $0x140] sm:$0xff]  ;;  %v304_v43 = vld [vmem:[#allocation5 + $0x148] sm:$0xff] }
  0x31   :  { %530 = vmatprep.subr.bf16.mxu0 %v658_v10  ;;  %550 = vmatpush3.bf16.msra.mxu1 %v549_v33  ;;  %v558_v41 = vpack.c.bf16 %v302_v40, %v301_v39  ;;  %v561_v44 = vpack.c.bf16 %v304_v43, %v303_v42  ;;  %v305_v45 = vld [vmem:[#allocation5 + $0x150] sm:$0xff]  ;;  %v306_v46 = vld [vmem:[#allocation5 + $0x158] sm:$0xff]  ;;  %v307_v48 = vld [vmem:[#allocation5 + $0x160] sm:$0xff] }
  0x32   :  { %551 = vmatprep.subr.bf16.mxu1 %v658_v10  ;;  %v564_v47 = vpack.c.bf16 %v306_v46, %v305_v45  ;;  %v308_v49 = vld [vmem:[#allocation5 + $0x168] sm:$0xff]  ;;  %v43_v54 = vld [vmem:[#allocation5 + $0x180] sm:$0xff]  ;;  %v309_v63 = vld [vmem:[#allocation5 + $0x170] sm:$0xff] }
  0x33   :  { %v567_v50 = vpack.c.bf16 %v308_v49, %v307_v48  ;;  %v201_v55 = vrot.slane %v43_v54, %v200_v53  ;;  %v310_v0 = vld [vmem:[#allocation5 + $0x178] sm:$0xff]  ;;  %v223_v3 = vrot.slane %v43_v54, %v222_v2  ;;  %v314_v9 = vrot.slane %v43_v54, %v313_v8 }
  0x34   :  { %532 = vmatpush3.bf16.msra.mxu0 %v531_v14  ;;  %v570_v1 = vpack.c.bf16 %v310_v0, %v309_v63 }
  0x35   :  { %533 = vmatprep.subr.bf16.mxu0 %v658_v10  ;;  %553 = vmatpush3.bf16.msra.mxu1 %v552_v35 }
  0x36   :  { %554 = vmatprep.subr.bf16.mxu1 %v658_v10 }
  0x38   :  { %535 = vmatpush3.bf16.msra.mxu0 %v534_v17 }
  0x39   :  { %536 = vmatprep.subr.bf16.mxu0 %v658_v10  ;;  %556 = vmatpush3.bf16.msra.mxu1 %v555_v38 }
  0x3a   :  { %557 = vmatprep.subr.bf16.mxu1 %v658_v10 }
  0x3c   :  { %538 = vmatpush3.bf16.msra.mxu0 %v537_v20 }
  0x3d   :  { %539 = vmatprep.subr.bf16.mxu0 %v658_v10  ;;  %559 = vmatpush3.bf16.msra.mxu1 %v558_v41 }
  0x3e   :  { %560 = vmatprep.subr.bf16.mxu1 %v658_v10 }
  0x40   :  { %541 = vmatpush3.bf16.msra.mxu0 %v540_v23 }
  0x41   :  { %542 = vmatprep.subr.bf16.mxu0 %v658_v10  ;;  %562 = vmatpush3.bf16.msra.mxu1 %v561_v44 }
  0x42   :  { %563 = vmatprep.subr.bf16.mxu1 %v658_v10 }
  0x44   :  { %544 = vmatpush3.bf16.msra.mxu0 %v543_v26 }
  0x45   :  { %545 = vmatprep.subr.bf16.mxu0 %v658_v10  ;;  %565 = vmatpush3.bf16.msra.mxu1 %v564_v47 }
  0x46   :  { %566 = vmatprep.subr.bf16.mxu1 %v658_v10 }
  0x48   :  { %547 = vmatpush3.bf16.msra.mxu0 %v546_v29 }
  0x49   :  { %568 = vmatpush3.bf16.msra.mxu1 %v567_v50 }
  0x4a   :  { %569 = vmatprep.subr.bf16.mxu1 %v658_v10 }
  0x4d   :  { %571 = vmatpush3.bf16.msra.mxu1 %v570_v1 }
  0xfd   :  { %v120_v56 = vpop.f32.mrb[0].mxu0  ;;  %v194_v57 = vpop.f32.mrb[0].mxu1 }
  0xfe   :  { %v195_v58 = vadd.f32 %v194_v57, %v120_v56  ;;  %v448_v59 = vpop.f32.mrb[1].mxu0  ;;  %v453_v60 = vpop.f32.mrb[1].mxu1 }
 0x100   :  { %v202_v61 = vadd.f32 %v201_v55, %v195_v58 }
 0x102   :  { %v203_v62 = vmax.f32 %v202_v61, 0.0 }
 0x104   :  { %487 = vmatmul.mubr.f32.vlgmr.msra.gmra.mrb[2].mxu0 %v203_v62 }
 0x1d7   :  { %v290_v4 = vpop.f32.mrb[2].mxu0 }
 0x1d8   :  { %v291_v5 = vadd.f32 %v290_v4, %v223_v3  ;;  %v488_v6 = vpop.f32.mrb[3].mxu0 }
 0x1da   :  { %v294_v7 = vmax.f32 %v291_v5, 0.0 }
 0x1dc   :  { %522 = vmatmul.mubr.f32.vlgmr.msra.gmra.mrb[2].mxu1 %v294_v7 }
 0x2af   :  { %v381_v10 = vpop.f32.mrb[2].mxu1 }
 0x2b0   :  { %v382_v11 = vadd.f32 %v381_v10, %v314_v9  ;;  %v523_v12 = vpop.f32.mrb[3].mxu1 }
 0x2b2   :  { %386 = vst.msk [vmem:[#allocation7] sm:$0x3] %vm385_vm4, %v382_v11 }
 0x2b3   :  { %635 = shalt.err (!%p632_p6)
}
 0x2b4   :  { %s636_s15 = scalar_lea.hbm %s749_s3, 32 }
 0x2b5   :  { %p637_p7 = scmp.ne.s32.totalorder %s749_s3, %s636_s15  ;;  %p640_p8 = scmp.lt.u32.totalorder %s636_s15, %s749_s3 }
 0x2b7   :  { %p642_p9 = pnand %p640_p8, %p637_p7 }
 0x2b9   :  { %645 = shalt.err (!%p642_p9)
}
 0x2ba   :  { %396 = dma.vmem_to_hbm [thread:$0]  %s394_s2, 32, %s749_s3, [#allocation4]  }
 0x2bb   :  { %650 = dma.done.wait [#allocation4], 32  }
 0x2bc   :  { %651 = vsyncadd [#allocation4], 4294967264 }
 0x2bd   :  { %400 = vsyncpa [#allocation3], 1 }
 0x2be   :  { %401 = vsyncpa [#allocation6], 1 }
 0x2bf   :  { %402 = vsyncpa [#allocation4], 1 }

</bundles_post_ra>
